<compile_context>
chip_gen: v7x
topology: tpu7x:2x2x1
jax: 0.10.0
libtpu: 0.0.40
codegen_flags: <defaults>
</compile_context>

<pallas_src>
import functools

import jax
import jax.numpy as jnp
from jax.experimental import pallas as pl
from jax.experimental.pallas import tpu as pltpu

_LANES = 128
_OUT_SUBLANES = 8
_NCORES = 2                 # used only when there is enough work (v7x megacore)
_MAX_TM = 2048              # (2048,128) f32 block = 1 MiB per input per buffer
_MIN_ROWS_FOR_SPLIT = 512   # below this, a 2-core split is pure overhead


def _bpr_loss_kernel(n_ref, inv_ref, pos_ref, neg_ref, out_ref, acc_ref,
                     *, gamma, tm, num_k):
    g = pl.program_id(0)            # core / row-half index ("parallel")
    k = pl.program_id(1)            # reduction tile index   ("arbitrary")

    @pl.when(k == 0)
    def _init():
        acc_ref[...] = jnp.zeros_like(acc_ref)

    n = n_ref[0]
    row0 = (g * num_k + k) * tm          # logical (unclamped) first row of tile
    start = row0 * _LANES                # flat index of first element of tile
    is_full = start + tm * _LANES <= n   # every element of this tile is valid
    is_partial = jnp.logical_and(start < n, jnp.logical_not(is_full))

    def _elementwise():
        diff = pos_ref[...].astype(jnp.float32) - neg_ref[...].astype(jnp.float32)
        # sigmoid via a single tanh: one EUP transcendental per element.
        sig = 0.5 * (jnp.tanh(0.5 * diff) + 1.0)
        return -jnp.log(gamma + sig)

    @pl.when(is_full)
    def _fast():                         # unmasked hot path (no iota / where)
        val = _elementwise()
        acc_ref[...] += val.reshape(tm // 8, 8, _LANES).sum(axis=0)

    @pl.when(is_partial)
    def _tail():                         # only the boundary tile pays for this
        val = _elementwise()
        row = jax.lax.broadcasted_iota(jnp.int32, (tm, _LANES), 0)
        col = jax.lax.broadcasted_iota(jnp.int32, (tm, _LANES), 1)
        flat = (row0 + row) * _LANES + col
        val = jnp.where(flat < n, val, 0.0)
        acc_ref[...] += val.reshape(tm // 8, 8, _LANES).sum(axis=0)

    @pl.when(k == num_k - 1)
    def _finish():
        total = jnp.sum(acc_ref[...])          # single small XLU reduce per core
        # 1/N scaling folded in here; full lane-dense (8,128) unmasked store.
        out_ref[...] = (jnp.full((_OUT_SUBLANES, _LANES), total, jnp.float32)
                        * inv_ref[0])


def bpr_loss(pos_score, neg_score, gamma=1e-10):
    assert pos_score.shape == neg_score.shape
    assert pos_score.ndim == 1
    n = pos_score.shape[0]
    assert n > 0
    assert n <= 2 ** 30, "int32 flat-index math in the kernel"

    # dtype-dependent sublane multiple: f32 -> 8, bf16 -> 16, int8/fp8 -> 32
    itemsize = min(pos_score.dtype.itemsize, neg_score.dtype.itemsize)
    sub = 8 * max(1, 4 // int(itemsize))

    rows = -(-n // _LANES)                         # ceil(n / 128)
    ncores = _NCORES if rows >= _MIN_ROWS_FOR_SPLIT else 1
    rows_per_core = -(-rows // ncores)
    tm = min(_MAX_TM, -(-rows_per_core // sub) * sub)
    num_k = -(-rows_per_core // tm)
    last_block = -(-rows // tm) - 1                # clamp: no DMA starts past array

    def to_tiles(x):
        rem = n % _LANES
        if rem:
            # TODO(synk): a tail-only side computation would avoid this O(N)
            # pad copy; for 128-aligned N (common) there is no copy at all.
            x = jnp.pad(x, (0, _LANES - rem))
        return x.reshape(-1, _LANES)               # free layout-preserving reshape

    pos2 = to_tiles(pos_score)
    neg2 = to_tiles(neg_score)
    n_arr = jnp.array([n], jnp.int32)
    inv_arr = jnp.array([1.0 / n], jnp.float32)

    kernel = functools.partial(_bpr_loss_kernel,
                               gamma=float(gamma), tm=tm, num_k=num_k)

    def in_map(g, k, n_ref, inv_ref):
        return (jnp.minimum(g * num_k + k, last_block), 0)

    partials = pl.pallas_call(
        kernel,
        out_shape=jax.ShapeDtypeStruct((ncores * _OUT_SUBLANES, _LANES),
                                       jnp.float32),
        grid_spec=pltpu.PrefetchScalarGridSpec(
            num_scalar_prefetch=2,
            grid=(ncores, num_k),
            in_specs=[
                pl.BlockSpec((tm, _LANES), in_map),
                pl.BlockSpec((tm, _LANES), in_map),
            ],
            out_specs=pl.BlockSpec((_OUT_SUBLANES, _LANES),
                                   lambda g, k, n_ref, inv_ref: (g, 0)),
            scratch_shapes=[pltpu.VMEM((_OUT_SUBLANES, _LANES), jnp.float32)],
        ),
        compiler_params=pltpu.CompilerParams(
            dimension_semantics=("parallel", "arbitrary"),
            vmem_limit_bytes=32 * 1024 * 1024,
        ),
    )(n_arr, inv_arr, pos2, neg2)

    # Kernel already applied the 1/N scaling; just add the per-core partials.
    return jnp.sum(partials[0::_OUT_SUBLANES, 0])


def _reference(pos, neg, gamma=1e-10):
    return -jnp.mean(jnp.log(gamma + jax.nn.sigmoid(pos - neg)))


def _check(key, n):
    k1, k2 = jax.random.split(key)
    pos = jax.random.normal(k1, (n,), dtype=jnp.float32)
    neg = jax.random.normal(k2, (n,), dtype=jnp.float32)
    out = bpr_loss(pos, neg)
    jax.block_until_ready(out)
    ref = _reference(pos, neg)
    assert jnp.allclose(out, ref, rtol=1e-4, atol=1e-6), (n, out, ref)


if __name__ == "__main__":
    key = jax.random.PRNGKey(0)
    keys = jax.random.split(key, 4)

    # Primary small case consistent with the module's (N,) score vectors.
    _check(keys[0], 8)
    # Mask + tail-pad path, single partial block.
    _check(keys[1], 2500)
    # 128-aligned (copy-free) path with a sublane-straddling final block.
    _check(keys[2], 2560)
    # Larger case: 2-core split, 2 reduction steps, tm=2048 fast + masked
    # paths and a clamped fully-out-of-range block.
    _check(keys[3], 2 * 2048 * 128 + 70000)

    print("KERNEL_OK")
</pallas_src>

<mosaic_0001>
module attributes {stable_mosaic.version = 11 : i64} {
  func.func @_bpr_loss_kernel(%arg0: i32, %arg1: i32, %arg2: memref<1xi32, #tpu.memory_space<smem>>, %arg3: memref<1xf32, #tpu.memory_space<smem>>, %arg4: memref<8x128xf32, #tpu.memory_space<vmem>>, %arg5: memref<8x128xf32, #tpu.memory_space<vmem>>, %arg6: memref<8x128xf32, #tpu.memory_space<vmem>>, %arg7: memref<8x128xf32, #tpu.memory_space<vmem>>) attributes {dimension_semantics = [#tpu.dimension_semantics<parallel>, #tpu.dimension_semantics<arbitrary>], iteration_bounds = array<i64: 1, 1>, scalar_prefetch = 2 : i64, scratch_operands = 1 : i64, tpu.core_type = #tpu.core_type<tc>, window_params = [{transform_indices = @transform_0, window_bounds = array<i64: 8, 128>}, {transform_indices = @transform_1, window_bounds = array<i64: 8, 128>}, {transform_indices = @transform_2, window_bounds = array<i64: 8, 128>}]} {
    %c0_i32 = arith.constant 0 : i32
    %0 = arith.cmpi eq, %arg1, %c0_i32 : i32
    %1 = arith.extui %0 : i1 to i32
    %c0_i32_0 = arith.constant 0 : i32
    %2 = arith.cmpi ne, %1, %c0_i32_0 : i32
    scf.if %2 {
      %cst = arith.constant 0.000000e+00 : f32
      %20 = vector.broadcast %cst : f32 to vector<8x128xf32>
      %c0_5 = arith.constant 0 : index
      %c0_6 = arith.constant 0 : index
      %21 = vector.load %arg7[%c0_5, %c0_6] : memref<8x128xf32, #tpu.memory_space<vmem>>, vector<8x128xf32>
      tpu.vector_store %arg7[%c0_5, %c0_6], %20 {strides = array<i32>} : memref<8x128xf32, #tpu.memory_space<vmem>>, vector<8x128xf32>,
    } else {
    }
    %c0 = arith.constant 0 : index
    %3 = memref.load %arg2[%c0] : memref<1xi32, #tpu.memory_space<smem>>
    %c1_i32 = arith.constant 1 : i32
    %4 = arith.muli %arg0, %c1_i32 : i32
    %5 = arith.addi %4, %arg1 : i32
    %c8_i32 = arith.constant 8 : i32
    %6 = arith.muli %5, %c8_i32 : i32
    %c128_i32 = arith.constant 128 : i32
    %7 = arith.muli %6, %c128_i32 : i32
    %c1024_i32 = arith.constant 1024 : i32
    %8 = arith.addi %7, %c1024_i32 : i32
    %9 = arith.cmpi sle, %8, %3 : i32
    %10 = arith.cmpi slt, %7, %3 : i32
    %true = arith.constant true
    %11 = arith.xori %9, %true : i1
    %12 = arith.andi %10, %11 : i1
    %13 = arith.extui %9 : i1 to i32
    %c0_i32_1 = arith.constant 0 : i32
    %14 = arith.cmpi ne, %13, %c0_i32_1 : i32
    scf.if %14 {
      %c0_5 = arith.constant 0 : index
      %c0_6 = arith.constant 0 : index
      %20 = vector.load %arg4[%c0_5, %c0_6] : memref<8x128xf32, #tpu.memory_space<vmem>>, vector<8x128xf32>
      %c0_7 = arith.constant 0 : index
      %c0_8 = arith.constant 0 : index
      %21 = vector.load %arg5[%c0_7, %c0_8] : memref<8x128xf32, #tpu.memory_space<vmem>>, vector<8x128xf32>
      %22 = arith.subf %20, %21 : vector<8x128xf32>
      %cst = arith.constant 5.000000e-01 : f32
      %23 = vector.broadcast %cst : f32 to vector<8x128xf32>
      %24 = arith.mulf %23, %22 : vector<8x128xf32>
      %25 = math.tanh %24 : vector<8x128xf32>
      %cst_9 = arith.constant 1.000000e+00 : f32
      %26 = vector.broadcast %cst_9 : f32 to vector<8x128xf32>
      %27 = arith.addf %25, %26 : vector<8x128xf32>
      %cst_10 = arith.constant 5.000000e-01 : f32
      %28 = vector.broadcast %cst_10 : f32 to vector<8x128xf32>
      %29 = arith.mulf %28, %27 : vector<8x128xf32>
      %cst_11 = arith.constant 1.000000e-10 : f32
      %30 = vector.broadcast %cst_11 : f32 to vector<8x128xf32>
      %31 = arith.addf %30, %29 : vector<8x128xf32>
      %32 = math.log %31 : vector<8x128xf32>
      %cst_12 = arith.constant 0.000000e+00 : f32
      %33 = vector.broadcast %cst_12 : f32 to vector<8x128xf32>
      %34 = arith.subf %33, %32 : vector<8x128xf32>
      %c0_13 = arith.constant 0 : index
      %c0_14 = arith.constant 0 : index
      %35 = vector.load %arg7[%c0_13, %c0_14] : memref<8x128xf32, #tpu.memory_space<vmem>>, vector<8x128xf32>
      %36 = vector.shape_cast %34 : vector<8x128xf32> to vector<1x8x128xf32>
      %cst_15 = arith.constant dense<0.000000e+00> : vector<8x128xf32>
      %37 = vector.multi_reduction <add>, %36, %cst_15 [0] : vector<1x8x128xf32> to vector<8x128xf32>
      %38 = arith.addf %35, %37 : vector<8x128xf32>
      %c0_16 = arith.constant 0 : index
      %c0_17 = arith.constant 0 : index
      %39 = vector.load %arg7[%c0_16, %c0_17] : memref<8x128xf32, #tpu.memory_space<vmem>>, vector<8x128xf32>
      tpu.vector_store %arg7[%c0_16, %c0_17], %38 {strides = array<i32>} : memref<8x128xf32, #tpu.memory_space<vmem>>, vector<8x128xf32>,
    } else {
    }
    %15 = arith.extui %12 : i1 to i32
    %c0_i32_2 = arith.constant 0 : i32
    %16 = arith.cmpi ne, %15, %c0_i32_2 : i32
    scf.if %16 {
      %c0_5 = arith.constant 0 : index
      %c0_6 = arith.constant 0 : index
      %20 = vector.load %arg4[%c0_5, %c0_6] : memref<8x128xf32, #tpu.memory_space<vmem>>, vector<8x128xf32>
      %c0_7 = arith.constant 0 : index
      %c0_8 = arith.constant 0 : index
      %21 = vector.load %arg5[%c0_7, %c0_8] : memref<8x128xf32, #tpu.memory_space<vmem>>, vector<8x128xf32>
      %22 = arith.subf %20, %21 : vector<8x128xf32>
      %cst = arith.constant 5.000000e-01 : f32
      %23 = vector.broadcast %cst : f32 to vector<8x128xf32>
      %24 = arith.mulf %23, %22 : vector<8x128xf32>
      %25 = math.tanh %24 : vector<8x128xf32>
      %cst_9 = arith.constant 1.000000e+00 : f32
      %26 = vector.broadcast %cst_9 : f32 to vector<8x128xf32>
      %27 = arith.addf %25, %26 : vector<8x128xf32>
      %cst_10 = arith.constant 5.000000e-01 : f32
      %28 = vector.broadcast %cst_10 : f32 to vector<8x128xf32>
      %29 = arith.mulf %28, %27 : vector<8x128xf32>
      %cst_11 = arith.constant 1.000000e-10 : f32
      %30 = vector.broadcast %cst_11 : f32 to vector<8x128xf32>
      %31 = arith.addf %30, %29 : vector<8x128xf32>
      %32 = math.log %31 : vector<8x128xf32>
      %cst_12 = arith.constant 0.000000e+00 : f32
      %33 = vector.broadcast %cst_12 : f32 to vector<8x128xf32>
      %34 = arith.subf %33, %32 : vector<8x128xf32>
      %35 = tpu.iota {dimensions = array<i32: 0>} : vector<8x128xi32>
      %36 = tpu.iota {dimensions = array<i32: 1>} : vector<8x128xi32>
      %37 = vector.broadcast %6 : i32 to vector<8x128xi32>
      %38 = arith.addi %37, %35 : vector<8x128xi32>
      %c128_i32_13 = arith.constant 128 : i32
      %39 = vector.broadcast %c128_i32_13 : i32 to vector<8x128xi32>
      %40 = arith.muli %38, %39 : vector<8x128xi32>
      %41 = arith.addi %40, %36 : vector<8x128xi32>
      %42 = vector.broadcast %3 : i32 to vector<8x128xi32>
      %43 = arith.cmpi slt, %41, %42 : vector<8x128xi32>
      %cst_14 = arith.constant 0.000000e+00 : f32
      %44 = vector.broadcast %cst_14 : f32 to vector<8x128xf32>
      %45 = arith.select %43, %34, %44 : vector<8x128xi1>, vector<8x128xf32>
      %c0_15 = arith.constant 0 : index
      %c0_16 = arith.constant 0 : index
      %46 = vector.load %arg7[%c0_15, %c0_16] : memref<8x128xf32, #tpu.memory_space<vmem>>, vector<8x128xf32>
      %47 = vector.shape_cast %45 : vector<8x128xf32> to vector<1x8x128xf32>
      %cst_17 = arith.constant dense<0.000000e+00> : vector<8x128xf32>
      %48 = vector.multi_reduction <add>, %47, %cst_17 [0] : vector<1x8x128xf32> to vector<8x128xf32>
      %49 = arith.addf %46, %48 : vector<8x128xf32>
      %c0_18 = arith.constant 0 : index
      %c0_19 = arith.constant 0 : index
      %50 = vector.load %arg7[%c0_18, %c0_19] : memref<8x128xf32, #tpu.memory_space<vmem>>, vector<8x128xf32>
      tpu.vector_store %arg7[%c0_18, %c0_19], %49 {strides = array<i32>} : memref<8x128xf32, #tpu.memory_space<vmem>>, vector<8x128xf32>,
    } else {
    }
    %c0_i32_3 = arith.constant 0 : i32
    %17 = arith.cmpi eq, %arg1, %c0_i32_3 : i32
    %18 = arith.extui %17 : i1 to i32
    %c0_i32_4 = arith.constant 0 : i32
    %19 = arith.cmpi ne, %18, %c0_i32_4 : i32
    scf.if %19 {
      %c0_5 = arith.constant 0 : index
      %c0_6 = arith.constant 0 : index
      %20 = vector.load %arg7[%c0_5, %c0_6] : memref<8x128xf32, #tpu.memory_space<vmem>>, vector<8x128xf32>
      %21 = vector.shape_cast %20 : vector<8x128xf32> to vector<1x8x128xf32>
      %cst = arith.constant dense<0.000000e+00> : vector<1xf32>
      %22 = vector.multi_reduction <add>, %21, %cst [1, 2] : vector<1x8x128xf32> to vector<1xf32>
      %23 = vector.shape_cast %22 : vector<1xf32> to vector<1x1x1xf32>
      %24 = vector.extract %23[0, 0, 0] : f32 from vector<1x1x1xf32>
      %25 = vector.broadcast %24 : f32 to vector<8x128xf32>
      %c0_7 = arith.constant 0 : index
      %26 = memref.load %arg3[%c0_7] : memref<1xf32, #tpu.memory_space<smem>>
      %27 = vector.broadcast %26 : f32 to vector<8x128xf32>
      %28 = arith.mulf %25, %27 : vector<8x128xf32>
      %c0_8 = arith.constant 0 : index
      %c0_9 = arith.constant 0 : index
      %29 = vector.load %arg6[%c0_8, %c0_9] : memref<8x128xf32, #tpu.memory_space<vmem>>, vector<8x128xf32>
      tpu.vector_store %arg6[%c0_8, %c0_9], %28 {strides = array<i32>} : memref<8x128xf32, #tpu.memory_space<vmem>>, vector<8x128xf32>,
    } else {
    }
    return
  }
  func.func @transform_0(%arg0: i32, %arg1: i32, %arg2: memref<1xi32, #tpu.memory_space<smem>>, %arg3: memref<1xf32, #tpu.memory_space<smem>>) -> (i32, i32) {
    %c1_i32 = arith.constant 1 : i32
    %0 = arith.muli %arg0, %c1_i32 : i32
    %1 = arith.addi %0, %arg1 : i32
    %c0_i32 = arith.constant 0 : i32
    %2 = arith.minsi %1, %c0_i32 : i32
    %c0_i32_0 = arith.constant 0 : i32
    %c0_i32_1 = arith.constant 0 : i32
    return %2, %c0_i32_0 : i32, i32
  }
  func.func @transform_1(%arg0: i32, %arg1: i32, %arg2: memref<1xi32, #tpu.memory_space<smem>>, %arg3: memref<1xf32, #tpu.memory_space<smem>>) -> (i32, i32) {
    %c1_i32 = arith.constant 1 : i32
    %0 = arith.muli %arg0, %c1_i32 : i32
    %1 = arith.addi %0, %arg1 : i32
    %c0_i32 = arith.constant 0 : i32
    %2 = arith.minsi %1, %c0_i32 : i32
    %c0_i32_0 = arith.constant 0 : i32
    %c0_i32_1 = arith.constant 0 : i32
    return %2, %c0_i32_0 : i32, i32
  }
  func.func @transform_2(%arg0: i32, %arg1: i32, %arg2: memref<1xi32, #tpu.memory_space<smem>>, %arg3: memref<1xf32, #tpu.memory_space<smem>>) -> (i32, i32) {
    %c0_i32 = arith.constant 0 : i32
    %c0_i32_0 = arith.constant 0 : i32
    return %arg0, %c0_i32 : i32, i32
  }
}

</mosaic_0001>

<bundles_post_ra>
// kernel: tpu_custom_call.1
= control target key start
LH: loop header
LB: loop body
LE: loop exit
PB: predicated region body
PF: predicated region fallthrough
CT: control target
= control target key end

     0   :  { %s302_s0 = inlined_call_operand.<no memory space> [shape: s32[1], index: 0, kind: input, shape index: {}]   ;;  %s303_s1 = inlined_call_operand.<no memory space> [shape: f32[1], index: 1, kind: input, shape index: {}]   ;;  %s304_s2 = inlined_call_operand.vmem [shape: f32[1,128], index: 2, kind: input, shape index: {}]   ;;  %s305_s3 = inlined_call_operand.vmem [shape: f32[1,128], index: 3, kind: input, shape index: {}]   ;;  %s306_s4 = inlined_call_operand.hbm [shape: f32[8,128], index: 4, kind: output, shape index: {}]  }
   0x1   :  { %10 = sst [smem:[#allocation5]] %s303_s1 }
   0x2   :  { %11 = vsyncpa [#allocation7], 0  ;;  %p194_p0 = scmp.gt.s32.totalorder %s302_s0, 0  ;;  %p195_p1 = scmp.lt.s32.totalorder %s302_s0, 1024  ;;  %v233_v0 = vmov 0.0  }
   0x3   :  { %98 = vst [vmem:[#allocation2] sm:$0xff] %v233_v0  ;;  %v112_v1 = vld [vmem:[%s304_s2] sm:$0xff] (!%p195_p1) }
   0x4   :  { %p269_p2 = pnand %p195_p1, %p194_p0  ;;  %111 = sbr.rel (%p195_p1) target bundleno = 44 (0x2c), region = 17  ;;  %v113_v2 = vld [vmem:[%s305_s3] sm:$0xff] (!%p195_p1) }
   0x5   :  { %v114_v3 = vsub.f32 (!%p195_p1), %v112_v1, %v113_v2 }
   0x7   :  { %v115_v4 = vmul.f32 (!%p195_p1), 0.5, %v114_v3 }
   0x9   :  { %201 = vtanh.f32 (!%p195_p1), %v115_v4 }
   0xa   :  { %v123_v11 = vld [vmem:[#allocation2] sm:$0xff] (!%p195_p1) }
  0x13   :  { %v202_v5 = vpop.eup %201 }
  0x14   :  { %v117_v6 = vadd.f32 1.0, %v202_v5 }
  0x16   :  { %v118_v7 = vmul.f32 0.5, %v117_v6 }
  0x18   :  { %v119_v8 = vadd.f32 1e-10, %v118_v7 }
  0x1a   :  { %203 = vlog2.f32 %v119_v8 }
  0x24   :  { %v204_v9 = vpop.eup %203 }
  0x25   :  { %v121_v10 = vmul.f32 0.6931472, %v204_v9 }
  0x27   :  { %v122_v12 = vsub.f32 0.0, %v121_v10 }
  0x29   :  { %v125_v13 = vadd.f32 %v123_v11, %v122_v12 }
  0x2b   :  { %126 = vst [vmem:[#allocation2] sm:$0xff] %v125_v13 }
  0x2c PF:  { %128 = sbr.rel (%p269_p2) target bundleno = 86 (0x56), region = 21  ;;  %v129_v14 = vld [vmem:[%s304_s2] sm:$0xff] (!%p269_p2)  ;;  %v140_v21 = vlaneseq (!%p269_p2)  ;;  %v148_v27 = vstv (!%p269_p2), %s302_s0 }
  0x2d   :  { %v130_v15 = vld [vmem:[%s305_s3] sm:$0xff] (!%p269_p2) }
  0x2e   :  { %v131_v16 = vsub.f32 (!%p269_p2), %v129_v14, %v130_v15  ;;  %v141_v23 = vshrl.u32 (!%p269_p2), %v140_v21, 7  ;;  %v143_v24 = vand.u32 (!%p269_p2), 127, %v140_v21 }
  0x30   :  { %v132_v17 = vmul.f32 (!%p269_p2), 0.5, %v131_v16  ;;  %v146_v25 = vmul.u32 (!%p269_p2), 128, %v141_v23 }
  0x32   :  { %205 = vtanh.f32 (!%p269_p2), %v132_v17  ;;  %v147_v26 = vadd.s32 (!%p269_p2), %v146_v25, %v143_v24  ;;  %v151_v31 = vld [vmem:[#allocation2] sm:$0xff] (!%p269_p2) }
  0x34   :  { %vm149_vm0 = vcmp.lt.s32.totalorder %v147_v26, %v148_v27 }
  0x3c   :  { %v206_v18 = vpop.eup %205 }
  0x3d   :  { %v134_v19 = vadd.f32 1.0, %v206_v18 }
  0x3f   :  { %v135_v20 = vmul.f32 0.5, %v134_v19 }
  0x41   :  { %v136_v22 = vadd.f32 1e-10, %v135_v20 }
  0x43   :  { %207 = vlog2.f32 %v136_v22 }
  0x4d   :  { %v208_v28 = vpop.eup %207 }
  0x4e   :  { %v138_v29 = vmul.f32 0.6931472, %v208_v28 }
  0x50   :  { %v139_v30 = vsub.f32 0.0, %v138_v29 }
  0x52   :  { %v150_v32 = vsel %vm149_vm0, %v139_v30, 0.0 }
  0x53   :  { %v153_v33 = vadd.f32 %v151_v31, %v150_v32 }
  0x55   :  { %154 = vst [vmem:[#allocation2] sm:$0xff] %v153_v33 }
  0x56 PF:  { %s169_s0 = sld [smem:[#allocation5]]  ;;  %s234_s2 = smov [#allocation6]  }
  0x57   :  { %s179_s3 = sshll.u32 %s234_s2, 4  ;;  %s180_s3 = int_to_ptr.vmem [resolvable:$true] %s179_s3 }
  0x58   :  { %s209_s6 = scalar_lea.vmem %s180_s3, 128  ;;  %p214_p4 = scmp.lt.s32.totalorder %s180_s3, %s180_s3 }
  0x59   :  { %p210_p3 = scmp.ne.s32.totalorder %s180_s3, %s209_s6  ;;  %p215_p5 = scmp.lt.s32.totalorder %s209_s6, %s209_s6 }
  0x5b   :  { %p216_p6 = por %p215_p5, %p214_p4 }
  0x5c   :  { %v158_v34 = vld [vmem:[#allocation2] sm:$0xff]  ;;  %v170_v42 = vstv %s169_s0 }
  0x5d   :  { %159 = vadd.xlane.f32.xlu0 %v158_v34  ;;  %p217_p7 = pnand %p216_p6, %p210_p3 }
  0xea   :  { %v160_v35 = vpop.xlane.xlu0 %159 }
  0xeb   :  { %v161_v36 = vrot.slane %v160_v35, 4 }
  0xed   :  { %v162_v37 = vadd.f32 %v161_v36, %v160_v35 }
  0xef   :  { %v163_v38 = vrot.slane %v162_v37, 2 }
  0xf1   :  { %v164_v39 = vadd.f32 %v163_v38, %v162_v37 }
  0xf3   :  { %v165_v40 = vrot.slane %v164_v39, 1 }
  0xf5   :  { %v166_v41 = vadd.f32 %v165_v40, %v164_v39 }
  0xf7   :  { %197 = vpush %v166_v41 }
 0x128   :  { %s198_s5 = spop %197 }
 0x129   :  { %v168_v43 = vstv %s198_s5 }
 0x12a   :  { %v171_v44 = vmul.f32 %v170_v42, %v168_v43 }
 0x12c   :  { %172 = vst [vmem:[#allocation6] sm:$0xff] %v171_v44 }
 0x12d   :  { %220 = shalt.err (!%p217_p7)
}
 0x12e   :  { %s221_s9 = scalar_lea.hbm %s306_s4, 128 }
 0x12f   :  { %p222_p8 = scmp.ne.s32.totalorder %s306_s4, %s221_s9  ;;  %p225_p9 = scmp.lt.u32.totalorder %s221_s9, %s306_s4 }
 0x131   :  { %p227_p10 = pnand %p225_p9, %p222_p8 }
 0x133   :  { %230 = shalt.err (!%p227_p10)
}
 0x134   :  { %182 = dma.vmem_to_hbm [thread:$0]  %s180_s3, 128, %s306_s4, [#allocation7]  }
 0x135   :  { %231 = dma.done.wait [#allocation7], 128  }
 0x136   :  { %232 = vsyncadd [#allocation7], 4294967168 }
 0x137   :  { %186 = vsyncpa [#allocation7], 1 }

</bundles_post_ra>
